<compile_context>
chip_gen: v6e
topology: v6e:2x2x1
jax: 0.10.0
libtpu: 0.0.40
codegen_flags: <defaults>
</compile_context>

<pallas_src>
import functools
import math

import jax
import jax.numpy as jnp
from jax.experimental import pallas as pl
from jax.experimental.pallas import tpu as pltpu

LOG_STD_MIN = -20.0
LOG_STD_MAX = 2.0


def _round_up(x, m):
    return ((x + m - 1) // m) * m


def _cdiv(a, b):
    return -(-a // b)


def _vmem_capacity_bytes():
    """Physical VMEM of the current chip; conservative (v7x-sized) fallback."""
    try:
        return int(pltpu.get_tpu_info().vmem_capacity_bytes)
    except Exception:
        return 64 << 20


def _pick_batch_tile(batch, h_p, vmem_cap):
    """Batch tile (multiple of 8) minimizing padding waste.

    Guarantees >= 2 grid steps when batch >= 16 (so v7x's two TensorCores both
    get work) and shrinks the tile when the tb*h_p h1/h2 temporaries would
    pressure VMEM.
    """
    batch = max(batch, 1)
    # Larger tiles on 128 MiB chips (v5e/v6e), 256 on 64 MiB v7x.
    max_tb = 512 if vmem_cap >= (96 << 20) else 256
    # h1 + h2 temporaries are 2 * tb * h_p * 4 bytes; keep under ~1/4 of VMEM.
    while max_tb > 8 and 2 * max_tb * h_p * 4 > vmem_cap // 4:
        max_tb //= 2
    max_tb = max(max_tb, 8)

    if batch <= 8:
        return _round_up(batch, 8)
    min_steps = 2 if batch >= 16 else 1
    steps = max(min_steps, _cdiv(batch, max_tb))
    return _round_up(_cdiv(batch, steps), 8)


def _policy_kernel(x_ref, w1_ref, b1_ref, w2_ref, b2_ref, wh_ref, bh_ref,
                   heads_ref, *, num_actions):
    x = x_ref[...]

    # linear1 + relu
    h1 = jnp.dot(x, w1_ref[...], preferred_element_type=jnp.float32) + b1_ref[...]
    h1 = jnp.maximum(h1, 0.0)

    # linear2 + relu
    h2 = jnp.dot(h1, w2_ref[...], preferred_element_type=jnp.float32) + b2_ref[...]
    h2 = jnp.maximum(h2, 0.0)

    # fused heads: one matmul producing [mean | log_std] packed contiguously
    heads = jnp.dot(h2, wh_ref[...], preferred_element_type=jnp.float32) + bh_ref[...]

    # clamp only the log_std lanes (columns >= num_actions); mean lanes pass
    # through untouched.  Padding lanes get clamped too, but are sliced away.
    col = jax.lax.broadcasted_iota(jnp.int32, heads.shape, 1)
    clamped = jnp.clip(heads, LOG_STD_MIN, LOG_STD_MAX)
    heads_ref[...] = jnp.where(col >= num_actions, clamped, heads).astype(
        heads_ref.dtype)


def prepare_params(params):
    """One-time zero-padding / head-packing of the weights.

    Call once and reuse the result across forward calls; this hoists the full
    parameter re-materialization off the per-call hot path.
    """
    w1, b1, w2, b2, wm, bm, ws, bs = params
    num_inputs, hidden = w1.shape
    num_actions = wm.shape[1]

    in_p = _round_up(num_inputs, 128)
    h_p = _round_up(hidden, 128)
    head_p = _round_up(2 * num_actions, 128)   # [mean | log_std] contiguous

    f32 = jnp.float32
    w1_p = jnp.zeros((in_p, h_p), f32).at[:num_inputs, :hidden].set(w1)
    b1_p = jnp.zeros((1, h_p), f32).at[:, :hidden].set(jnp.reshape(b1, (1, hidden)))
    w2_p = jnp.zeros((h_p, h_p), f32).at[:hidden, :hidden].set(w2)
    b2_p = jnp.zeros((1, h_p), f32).at[:, :hidden].set(jnp.reshape(b2, (1, hidden)))
    wh_p = (jnp.zeros((h_p, head_p), f32)
            .at[:hidden, :num_actions].set(wm)
            .at[:hidden, num_actions:2 * num_actions].set(ws))
    bh_p = (jnp.zeros((1, head_p), f32)
            .at[:, :num_actions].set(jnp.reshape(bm, (1, num_actions)))
            .at[:, num_actions:2 * num_actions].set(jnp.reshape(bs, (1, num_actions))))

    padded = (w1_p, b1_p, w2_p, b2_p, wh_p, bh_p)
    meta = dict(num_inputs=num_inputs, hidden=hidden, num_actions=num_actions,
                in_p=in_p, h_p=h_p, head_p=head_p)
    return padded, meta


def policy_forward(state, prepared):
    """Runs the PolicyNetwork forward pass. Returns (mean, log_std)."""
    (w1_p, b1_p, w2_p, b2_p, wh_p, bh_p), meta = prepared
    num_inputs = meta["num_inputs"]
    num_actions = meta["num_actions"]
    in_p, h_p, head_p = meta["in_p"], meta["h_p"], meta["head_p"]

    batch = state.shape[0]
    vmem_cap = _vmem_capacity_bytes()

    tb = _pick_batch_tile(batch, h_p, vmem_cap)
    b_p = _round_up(max(batch, 1), tb)
    grid = (b_p // tb,)

    # only per-call padding: the streamed activations (exact: zero padding)
    x_p = jnp.zeros((b_p, in_p), jnp.float32).at[:batch, :num_inputs].set(state)

    resident = pl.Buffered(1)   # constant index_map -> single-buffer in VMEM
    in_specs = [
        pl.BlockSpec((tb, in_p), lambda i: (i, 0)),                              # state
        pl.BlockSpec((in_p, h_p), lambda i: (0, 0), pipeline_mode=resident),     # W1
        pl.BlockSpec((1, h_p), lambda i: (0, 0), pipeline_mode=resident),        # b1
        pl.BlockSpec((h_p, h_p), lambda i: (0, 0), pipeline_mode=resident),      # W2
        pl.BlockSpec((1, h_p), lambda i: (0, 0), pipeline_mode=resident),        # b2
        pl.BlockSpec((h_p, head_p), lambda i: (0, 0), pipeline_mode=resident),   # Wh
        pl.BlockSpec((1, head_p), lambda i: (0, 0), pipeline_mode=resident),     # bh
    ]
    out_specs = pl.BlockSpec((tb, head_p), lambda i: (i, 0))
    out_shape = jax.ShapeDtypeStruct((b_p, head_p), jnp.float32)

    # VMEM budget: single-buffered resident weights + double-buffered streamed
    # tiles + h1/h2/heads temporaries, with ~25% headroom, capped below the
    # physical VMEM of the detected chip (leaves margin for compiler scratch).
    weight_bytes = 4 * (in_p * h_p + h_p + h_p * h_p + h_p + h_p * head_p + head_p)
    io_bytes = 4 * tb * (in_p + head_p) * 2
    tmp_bytes = 4 * tb * (2 * h_p + head_p)
    need = weight_bytes + io_bytes + tmp_bytes
    vmem_limit = int(min(max(int(need * 1.25), 32 << 20), int(vmem_cap * 0.82)))

    flops = 2 * b_p * (in_p * h_p + h_p * h_p + h_p * head_p)
    bytes_accessed = weight_bytes + 4 * b_p * (in_p + head_p)

    heads_p = pl.pallas_call(
        functools.partial(_policy_kernel, num_actions=num_actions),
        out_shape=out_shape,
        grid_spec=pltpu.PrefetchScalarGridSpec(
            num_scalar_prefetch=0,
            grid=grid,
            in_specs=in_specs,
            out_specs=out_specs,
        ),
        compiler_params=pltpu.CompilerParams(
            dimension_semantics=("parallel",),   # v7x: shard batch across 2 TCs
            vmem_limit_bytes=vmem_limit,
        ),
        cost_estimate=pl.CostEstimate(
            flops=int(flops),
            transcendentals=0,
            bytes_accessed=int(bytes_accessed),
        ),
    )(x_p, w1_p, b1_p, w2_p, b2_p, wh_p, bh_p)

    mean = heads_p[:batch, :num_actions]
    log_std = heads_p[:batch, num_actions:2 * num_actions]
    return mean, log_std


def init_policy_params(key, num_inputs, num_actions, hidden_size):
    """Deterministic parameter init mirroring the PyTorch module's __init__.

    - linear1 / linear2 / head weights: kaiming_uniform_(nonlinearity='relu')
      => U(-bound, bound) with bound = sqrt(6 / fan_in)
    - linear1 / linear2 biases: zero
    - head biases: default nn.Linear init U(-1/sqrt(fan_in), 1/sqrt(fan_in))
    Weights are stored transposed (in, out) for the x @ W convention.
    """
    ks = jax.random.split(key, 6)

    def kaiming_uniform(k, fan_in, fan_out):
        bound = math.sqrt(6.0 / fan_in)
        return jax.random.uniform(k, (fan_in, fan_out), jnp.float32, -bound, bound)

    def bias_uniform(k, fan_in, fan_out):
        bound = 1.0 / math.sqrt(fan_in)
        return jax.random.uniform(k, (1, fan_out), jnp.float32, -bound, bound)

    w1 = kaiming_uniform(ks[0], num_inputs, hidden_size)
    b1 = jnp.zeros((1, hidden_size), jnp.float32)
    w2 = kaiming_uniform(ks[1], hidden_size, hidden_size)
    b2 = jnp.zeros((1, hidden_size), jnp.float32)
    wm = kaiming_uniform(ks[2], hidden_size, num_actions)
    bm = bias_uniform(ks[3], hidden_size, num_actions)
    ws = kaiming_uniform(ks[4], hidden_size, num_actions)
    bs = bias_uniform(ks[5], hidden_size, num_actions)
    return (w1, b1, w2, b2, wm, bm, ws, bs)


def _reference_forward(state, params):
    w1, b1, w2, b2, wm, bm, ws, bs = params
    h1 = jnp.maximum(state @ w1 + b1, 0.0)
    h2 = jnp.maximum(h1 @ w2 + b2, 0.0)
    mean = h2 @ wm + bm
    log_std = jnp.clip(h2 @ ws + bs, LOG_STD_MIN, LOG_STD_MAX)
    return mean, log_std


if __name__ == "__main__":
    key = jax.random.PRNGKey(0)
    k_params, k_state1, k_state2 = jax.random.split(key, 3)

    num_inputs = 16
    hidden_size = 32
    num_actions = 8

    params = init_policy_params(k_params, num_inputs, num_actions, hidden_size)
    prepared = prepare_params(params)   # one-time weight padding/packing

    # small batch (single grid step)
    state_a = jax.random.normal(k_state1, (4, num_inputs), jnp.float32)
    mean_a, log_std_a = policy_forward(state_a, prepared)
    jax.block_until_ready((mean_a, log_std_a))

    mean_ref_a, log_std_ref_a = _reference_forward(state_a, params)
    assert mean_a.shape == (4, num_actions)
    assert log_std_a.shape == (4, num_actions)
    assert jnp.allclose(mean_a, mean_ref_a, atol=1e-5, rtol=1e-5)
    assert jnp.allclose(log_std_a, log_std_ref_a, atol=1e-5, rtol=1e-5)

    # batch >= 16 exercises the multi-step ("parallel") grid path
    state_b = jax.random.normal(k_state2, (20, num_inputs), jnp.float32)
    mean_b, log_std_b = policy_forward(state_b, prepared)
    jax.block_until_ready((mean_b, log_std_b))

    mean_ref_b, log_std_ref_b = _reference_forward(state_b, params)
    assert mean_b.shape == (20, num_actions)
    assert log_std_b.shape == (20, num_actions)
    assert jnp.allclose(mean_b, mean_ref_b, atol=1e-5, rtol=1e-5)
    assert jnp.allclose(log_std_b, log_std_ref_b, atol=1e-5, rtol=1e-5)

    print("KERNEL_OK")
</pallas_src>

<mosaic_0001>
module attributes {stable_mosaic.version = 11 : i64} {
  func.func @_policy_kernel(%arg0: i32, %arg1: memref<8x128xf32, #tpu.memory_space<vmem>>, %arg2: memref<128x128xf32, #tpu.memory_space<vmem>>, %arg3: memref<1x128xf32, #tpu.memory_space<vmem>>, %arg4: memref<128x128xf32, #tpu.memory_space<vmem>>, %arg5: memref<1x128xf32, #tpu.memory_space<vmem>>, %arg6: memref<128x128xf32, #tpu.memory_space<vmem>>, %arg7: memref<1x128xf32, #tpu.memory_space<vmem>>, %arg8: memref<8x128xf32, #tpu.memory_space<vmem>>) attributes {dimension_semantics = [#tpu.dimension_semantics<parallel>], iteration_bounds = array<i64: 1>, scalar_prefetch = 0 : i64, scratch_operands = 0 : i64, tpu.core_type = #tpu.core_type<tc>, window_params = [{transform_indices = @transform_0, window_bounds = array<i64: 8, 128>}, {pipeline_mode = #tpu.pipeline_mode<synchronous>, transform_indices = @transform_1, window_bounds = array<i64: 128, 128>}, {pipeline_mode = #tpu.pipeline_mode<synchronous>, transform_indices = @transform_2, window_bounds = array<i64: 1, 128>}, {pipeline_mode = #tpu.pipeline_mode<synchronous>, transform_indices = @transform_3, window_bounds = array<i64: 128, 128>}, {pipeline_mode = #tpu.pipeline_mode<synchronous>, transform_indices = @transform_4, window_bounds = array<i64: 1, 128>}, {pipeline_mode = #tpu.pipeline_mode<synchronous>, transform_indices = @transform_5, window_bounds = array<i64: 128, 128>}, {pipeline_mode = #tpu.pipeline_mode<synchronous>, transform_indices = @transform_6, window_bounds = array<i64: 1, 128>}, {transform_indices = @transform_7, window_bounds = array<i64: 8, 128>}]} {
    %c0 = arith.constant 0 : index
    %c0_0 = arith.constant 0 : index
    %0 = vector.load %arg1[%c0, %c0_0] : memref<8x128xf32, #tpu.memory_space<vmem>>, vector<8x128xf32>
    %c0_1 = arith.constant 0 : index
    %c0_2 = arith.constant 0 : index
    %1 = vector.load %arg2[%c0_1, %c0_2] : memref<128x128xf32, #tpu.memory_space<vmem>>, vector<128x128xf32>
    %cst = arith.constant dense<0.000000e+00> : vector<8x128xf32>
    %2 = tpu.matmul %0, %1, %cst {dimension_numbers = #tpu.dot_dimension_numbers<[1], [0], [0], [1], [0, 0, 1, 1], [], []>} : vector<8x128xf32>, vector<128x128xf32>, vector<8x128xf32> -> vector<8x128xf32>
    %c0_3 = arith.constant 0 : index
    %c0_4 = arith.constant 0 : index
    %3 = vector.load %arg3[%c0_3, %c0_4] : memref<1x128xf32, #tpu.memory_space<vmem>>, vector<1x128xf32>
    %4 = vector.broadcast %3 : vector<1x128xf32> to vector<8x128xf32>
    %5 = arith.addf %2, %4 : vector<8x128xf32>
    %cst_5 = arith.constant 0.000000e+00 : f32
    %6 = vector.broadcast %cst_5 : f32 to vector<8x128xf32>
    %7 = arith.maximumf %5, %6 : vector<8x128xf32>
    %c0_6 = arith.constant 0 : index
    %c0_7 = arith.constant 0 : index
    %8 = vector.load %arg4[%c0_6, %c0_7] : memref<128x128xf32, #tpu.memory_space<vmem>>, vector<128x128xf32>
    %cst_8 = arith.constant dense<0.000000e+00> : vector<8x128xf32>
    %9 = tpu.matmul %7, %8, %cst_8 {dimension_numbers = #tpu.dot_dimension_numbers<[1], [0], [0], [1], [0, 0, 1, 1], [], []>} : vector<8x128xf32>, vector<128x128xf32>, vector<8x128xf32> -> vector<8x128xf32>
    %c0_9 = arith.constant 0 : index
    %c0_10 = arith.constant 0 : index
    %10 = vector.load %arg5[%c0_9, %c0_10] : memref<1x128xf32, #tpu.memory_space<vmem>>, vector<1x128xf32>
    %11 = vector.broadcast %10 : vector<1x128xf32> to vector<8x128xf32>
    %12 = arith.addf %9, %11 : vector<8x128xf32>
    %cst_11 = arith.constant 0.000000e+00 : f32
    %13 = vector.broadcast %cst_11 : f32 to vector<8x128xf32>
    %14 = arith.maximumf %12, %13 : vector<8x128xf32>
    %c0_12 = arith.constant 0 : index
    %c0_13 = arith.constant 0 : index
    %15 = vector.load %arg6[%c0_12, %c0_13] : memref<128x128xf32, #tpu.memory_space<vmem>>, vector<128x128xf32>
    %cst_14 = arith.constant dense<0.000000e+00> : vector<8x128xf32>
    %16 = tpu.matmul %14, %15, %cst_14 {dimension_numbers = #tpu.dot_dimension_numbers<[1], [0], [0], [1], [0, 0, 1, 1], [], []>} : vector<8x128xf32>, vector<128x128xf32>, vector<8x128xf32> -> vector<8x128xf32>
    %c0_15 = arith.constant 0 : index
    %c0_16 = arith.constant 0 : index
    %17 = vector.load %arg7[%c0_15, %c0_16] : memref<1x128xf32, #tpu.memory_space<vmem>>, vector<1x128xf32>
    %18 = vector.broadcast %17 : vector<1x128xf32> to vector<8x128xf32>
    %19 = arith.addf %16, %18 : vector<8x128xf32>
    %20 = tpu.iota {dimensions = array<i32: 1>} : vector<8x128xi32>
    %cst_17 = arith.constant -2.000000e+01 : f32
    %cst_18 = arith.constant 2.000000e+00 : f32
    %21 = vector.broadcast %cst_17 : f32 to vector<8x128xf32>
    %22 = arith.maximumf %21, %19 : vector<8x128xf32>
    %23 = vector.broadcast %cst_18 : f32 to vector<8x128xf32>
    %24 = arith.minimumf %23, %22 : vector<8x128xf32>
    %c8_i32 = arith.constant 8 : i32
    %25 = vector.broadcast %c8_i32 : i32 to vector<8x128xi32>
    %26 = arith.cmpi sge, %20, %25 : vector<8x128xi32>
    %27 = arith.select %26, %24, %19 : vector<8x128xi1>, vector<8x128xf32>
    %c0_19 = arith.constant 0 : index
    %c0_20 = arith.constant 0 : index
    %28 = vector.load %arg8[%c0_19, %c0_20] : memref<8x128xf32, #tpu.memory_space<vmem>>, vector<8x128xf32>
    tpu.vector_store %arg8[%c0_19, %c0_20], %27 {strides = array<i32>} : memref<8x128xf32, #tpu.memory_space<vmem>>, vector<8x128xf32>,
    return
  }
  func.func @transform_0(%arg0: i32) -> (i32, i32) {
    %c0_i32 = arith.constant 0 : i32
    %c0_i32_0 = arith.constant 0 : i32
    return %arg0, %c0_i32 : i32, i32
  }
  func.func @transform_1(%arg0: i32) -> (i32, i32) {
    %c0_i32 = arith.constant 0 : i32
    %c0_i32_0 = arith.constant 0 : i32
    %c0_i32_1 = arith.constant 0 : i32
    return %c0_i32, %c0_i32_0 : i32, i32
  }
  func.func @transform_2(%arg0: i32) -> (i32, i32) {
    %c0_i32 = arith.constant 0 : i32
    %c0_i32_0 = arith.constant 0 : i32
    %c0_i32_1 = arith.constant 0 : i32
    return %c0_i32, %c0_i32_0 : i32, i32
  }
  func.func @transform_3(%arg0: i32) -> (i32, i32) {
    %c0_i32 = arith.constant 0 : i32
    %c0_i32_0 = arith.constant 0 : i32
    %c0_i32_1 = arith.constant 0 : i32
    return %c0_i32, %c0_i32_0 : i32, i32
  }
  func.func @transform_4(%arg0: i32) -> (i32, i32) {
    %c0_i32 = arith.constant 0 : i32
    %c0_i32_0 = arith.constant 0 : i32
    %c0_i32_1 = arith.constant 0 : i32
    return %c0_i32, %c0_i32_0 : i32, i32
  }
  func.func @transform_5(%arg0: i32) -> (i32, i32) {
    %c0_i32 = arith.constant 0 : i32
    %c0_i32_0 = arith.constant 0 : i32
    %c0_i32_1 = arith.constant 0 : i32
    return %c0_i32, %c0_i32_0 : i32, i32
  }
  func.func @transform_6(%arg0: i32) -> (i32, i32) {
    %c0_i32 = arith.constant 0 : i32
    %c0_i32_0 = arith.constant 0 : i32
    %c0_i32_1 = arith.constant 0 : i32
    return %c0_i32, %c0_i32_0 : i32, i32
  }
  func.func @transform_7(%arg0: i32) -> (i32, i32) {
    %c0_i32 = arith.constant 0 : i32
    %c0_i32_0 = arith.constant 0 : i32
    return %arg0, %c0_i32 : i32, i32
  }
}

</mosaic_0001>

<bundles_post_ra>
// kernel: tpu_custom_call.1
= control target key start
LH: loop header
LB: loop body
LE: loop exit
PB: predicated region body
PF: predicated region fallthrough
CT: control target
= control target key end

     0   :  { %12 = vsyncpa [#allocation3], 0  ;;  %s798_s0 = inlined_call_operand.hbm [shape: f32[8,128], index: 0, kind: input, shape index: {}]   ;;  %s799_s1 = inlined_call_operand.hbm [shape: f32[128,128], index: 1, kind: input, shape index: {}]   ;;  %s800_s2 = inlined_call_operand.vmem [shape: f32[1,128], index: 2, kind: input, shape index: {}]   ;;  %s801_s3 = inlined_call_operand.hbm [shape: f32[128,128], index: 3, kind: input, shape index: {}]   ;;  %s802_s4 = inlined_call_operand.vmem [shape: f32[1,128], index: 4, kind: input, shape index: {}]   ;;  %s803_s5 = inlined_call_operand.hbm [shape: f32[128,128], index: 5, kind: input, shape index: {}]   ;;  %s804_s6 = inlined_call_operand.vmem [shape: f32[1,128], index: 6, kind: input, shape index: {}]   ;;  %s805_s7 = inlined_call_operand.hbm [shape: f32[8,128], index: 7, kind: output, shape index: {}]  }
   0x1   :  { %13 = vsyncpa [#allocation6], 0 }
   0x2   :  { %14 = vsyncpa [#allocation9], 0 }
   0x3   :  { %15 = vsyncpa [#allocation4], 0  ;;  %s662_s24 = smov [#allocation5]  }
   0x4   :  { %s31_s25 = sshll.u32 %s662_s24, 4  ;;  %s32_s25 = int_to_ptr.vmem [resolvable:$true] %s31_s25 }
   0x5   :  { %s562_s26 = scalar_lea.vmem %s32_s25, 2048  ;;  %p567_p1 = scmp.lt.s32.totalorder %s32_s25, %s32_s25 }
   0x6   :  { %p563_p0 = scmp.ne.s32.totalorder %s32_s25, %s562_s26  ;;  %p568_p2 = scmp.lt.s32.totalorder %s562_s26, %s562_s26 }
   0x8   :  { %p569_p3 = por %p568_p2, %p567_p1 }
   0xa   :  { %p570_p4 = pnand %p569_p3, %p563_p0 }
   0xc   :  { %573 = shalt.err (!%p570_p4)
}
   0xd   :  { %s663_s27 = smov 128   ;;  %s664_s28 = smov 8  }
   0xe   :  { %37 = dma.hbm_to_vmem [thread:$0]  %s799_s1, 2048, %s32_s25, [#allocation6], %s663_s27, %s663_s27, %s664_s28  }
   0xf   :  { %s665_s8 = smov [#allocation2]   ;;  %s666_s10 = smov [#allocation7]  }
  0x10   :  { %s22_s9 = sshll.u32 %s665_s8, 4  ;;  %s45_s11 = sshll.u32 %s666_s10, 4  ;;  %s23_s9 = int_to_ptr.vmem [resolvable:$true] %s22_s9  ;;  %s46_s11 = int_to_ptr.vmem [resolvable:$true] %s45_s11 }
  0x11   :  { %s582_s12 = scalar_lea.vmem %s23_s9, 128  ;;  %p587_p6 = scmp.lt.s32.totalorder %s23_s9, %s23_s9 }
  0x12   :  { %p583_p5 = scmp.ne.s32.totalorder %s23_s9, %s582_s12  ;;  %p588_p7 = scmp.lt.s32.totalorder %s582_s12, %s582_s12 }
  0x14   :  { %p589_p8 = por %p588_p7, %p587_p6 }
  0x16   :  { %p590_p9 = pnand %p589_p8, %p583_p5 }
  0x18   :  { %593 = shalt.err (!%p590_p9)
}
  0x19   :  { %25 = dma.hbm_to_vmem [thread:$0]  %s798_s0, 128, %s23_s9, [#allocation3]  }
  0x1a   :  { %s602_s15 = scalar_lea.vmem %s46_s11, 2048  ;;  %p607_p11 = scmp.lt.s32.totalorder %s46_s11, %s46_s11 }
  0x1b   :  { %p603_p10 = scmp.ne.s32.totalorder %s46_s11, %s602_s15  ;;  %p608_p12 = scmp.lt.s32.totalorder %s602_s15, %s602_s15 }
  0x1d   :  { %p609_p13 = por %p608_p12, %p607_p11 }
  0x1f   :  { %p610_p0 = pnand %p609_p13, %p603_p10 }
  0x21   :  { %613 = shalt.err (!%p610_p0)
}
  0x22   :  { %51 = dma.hbm_to_vmem [thread:$0]  %s801_s3, 2048, %s46_s11, [#allocation6], %s663_s27, %s663_s27, %s664_s28  }
  0x23   :  { %s667_s17 = smov [#allocation8]  }
  0x24   :  { %s59_s18 = sshll.u32 %s667_s17, 4  ;;  %s60_s18 = int_to_ptr.vmem [resolvable:$true] %s59_s18 }
  0x25   :  { %s622_s19 = scalar_lea.vmem %s60_s18, 2048  ;;  %p627_p2 = scmp.lt.s32.totalorder %s60_s18, %s60_s18 }
  0x26   :  { %p623_p1 = scmp.ne.s32.totalorder %s60_s18, %s622_s19  ;;  %p628_p3 = scmp.lt.s32.totalorder %s622_s19, %s622_s19 }
  0x28   :  { %p629_p4 = por %p628_p3, %p627_p2 }
  0x2a   :  { %p630_p5 = pnand %p629_p4, %p623_p1 }
  0x2c   :  { %633 = shalt.err (!%p630_p5)
}
  0x2d   :  { %65 = dma.hbm_to_vmem [thread:$0]  %s803_s5, 2048, %s60_s18, [#allocation9], %s663_s27, %s663_s27, %s664_s28  }
  0x2e   :  { %654 = dma.done.wait [#allocation3], 128  }
  0x2f   :  { %655 = vsyncadd [#allocation3], 4294967168 }
  0x30   :  { %656 = dma.done.wait [#allocation6], 4096  }
  0x31   :  { %657 = vsyncadd [#allocation6], 4294963200 }
  0x32   :  { %658 = dma.done.wait [#allocation9], 2048  }
  0x33   :  { %659 = vsyncadd [#allocation9], 4294965248  ;;  %v668_v0 = vmov 0.0   ;;  %vm669_vm0 = vmmov 0   ;;  %v96_v1 = vld [vmem:[#allocation5 + $0x78] sm:$0xff]  ;;  %v95_v2 = vld [vmem:[#allocation5 + $0x70] sm:$0xff]  ;;  %v362_v60 = vlaneseq }
  0x34   :  { %440 = vmatprep.subr.mxu0 %v668_v0  ;;  %472 = vmatprep.mubr.msk.f32.mxu0 %vm669_vm0, %v668_v0  ;;  %v94_v3 = vld [vmem:[#allocation5 + $0x68] sm:$0xff]  ;;  %v93_v4 = vld [vmem:[#allocation5 + $0x60] sm:$0xff]  ;;  %v190_v5 = vld [vmem:[#allocation7 + $0x78] sm:$0xff]  ;;  %s670_s24 = smov [#allocation10]  }
  0x35   :  { %475 = vmatprep.subr.mxu1 %v668_v0  ;;  %507 = vmatprep.mubr.msk.f32.mxu1 %vm669_vm0, %v668_v0  ;;  %v92_v6 = vld [vmem:[#allocation5 + $0x58] sm:$0xff]  ;;  %v189_v7 = vld [vmem:[#allocation7 + $0x70] sm:$0xff]  ;;  %v188_v8 = vld [vmem:[#allocation7 + $0x68] sm:$0xff]  ;;  %v363_v63 = vand.u32 127, %v362_v60  ;;  %s375_s25 = sshll.u32 %s670_s24, 4  ;;  %s376_s25 = int_to_ptr.vmem [resolvable:$true] %s375_s25 }
  0x36   :  { %441 = vmatpush3.msra.mxu0 %v96_v1  ;;  %476 = vmatpush3.msra.mxu1 %v190_v5  ;;  %v91_v9 = vld [vmem:[#allocation5 + $0x50] sm:$0xff]  ;;  %v187_v10 = vld [vmem:[#allocation7 + $0x60] sm:$0xff]  ;;  %v90_v11 = vld [vmem:[#allocation5 + $0x48] sm:$0xff]  ;;  %p639_p7 = scmp.lt.s32.totalorder %s376_s25, %s376_s25 }
  0x37   :  { %442 = vmatprep.subr.mxu0 %v668_v0  ;;  %477 = vmatprep.subr.mxu1 %v668_v0  ;;  %v186_v12 = vld [vmem:[#allocation7 + $0x58] sm:$0xff]  ;;  %v89_v13 = vld [vmem:[#allocation5 + $0x40] sm:$0xff]  ;;  %v185_v14 = vld [vmem:[#allocation7 + $0x50] sm:$0xff]  ;;  %vm366_vm1 = vcmp.ge.s32.totalorder %v363_v63, 8 }
  0x38   :  { %443 = vmatpush3.msra.mxu0 %v95_v2  ;;  %478 = vmatpush3.msra.mxu1 %v189_v7  ;;  %v88_v15 = vld [vmem:[#allocation5 + $0x38] sm:$0xff]  ;;  %v184_v16 = vld [vmem:[#allocation7 + $0x48] sm:$0xff]  ;;  %v87_v17 = vld [vmem:[#allocation5 + $0x30] sm:$0xff] }
  0x39   :  { %444 = vmatprep.subr.mxu0 %v668_v0  ;;  %479 = vmatprep.subr.mxu1 %v668_v0  ;;  %v183_v18 = vld [vmem:[#allocation7 + $0x40] sm:$0xff]  ;;  %v86_v19 = vld [vmem:[#allocation5 + $0x28] sm:$0xff]  ;;  %v182_v20 = vld [vmem:[#allocation7 + $0x38] sm:$0xff] }
  0x3a   :  { %445 = vmatpush3.msra.mxu0 %v94_v3  ;;  %480 = vmatpush3.msra.mxu1 %v188_v8  ;;  %v85_v21 = vld [vmem:[#allocation5 + $0x20] sm:$0xff]  ;;  %v181_v22 = vld [vmem:[#allocation7 + $0x30] sm:$0xff]  ;;  %v84_v23 = vld [vmem:[#allocation5 + $0x18] sm:$0xff] }
  0x3b   :  { %446 = vmatprep.subr.mxu0 %v668_v0  ;;  %481 = vmatprep.subr.mxu1 %v668_v0  ;;  %v180_v24 = vld [vmem:[#allocation7 + $0x28] sm:$0xff]  ;;  %v83_v25 = vld [vmem:[#allocation5 + $0x10] sm:$0xff]  ;;  %v179_v26 = vld [vmem:[#allocation7 + $0x20] sm:$0xff] }
  0x3c   :  { %447 = vmatpush3.msra.mxu0 %v93_v4  ;;  %482 = vmatpush3.msra.mxu1 %v187_v10  ;;  %v82_v27 = vld [vmem:[#allocation5 + $0x8] sm:$0xff]  ;;  %v178_v28 = vld [vmem:[#allocation7 + $0x18] sm:$0xff]  ;;  %v81_v29 = vld [vmem:[#allocation5] sm:$0xff] }
  0x3d   :  { %448 = vmatprep.subr.mxu0 %v668_v0  ;;  %483 = vmatprep.subr.mxu1 %v668_v0  ;;  %v80_v30 = vld [vmem:[#allocation2] sm:$0xff]  ;;  %v177_v31 = vld [vmem:[#allocation7 + $0x10] sm:$0xff]  ;;  %v176_v32 = vld [vmem:[#allocation7 + $0x8] sm:$0xff] }
  0x3e   :  { %449 = vmatpush3.msra.mxu0 %v92_v6  ;;  %484 = vmatpush3.msra.mxu1 %v186_v12  ;;  %v175_v33 = vld [vmem:[#allocation7] sm:$0xff]  ;;  %v284_v34 = vld [vmem:[#allocation8 + $0x78] sm:$0xff]  ;;  %v283_v35 = vld [vmem:[#allocation8 + $0x70] sm:$0xff] }
  0x3f   :  { %450 = vmatprep.subr.mxu0 %v668_v0  ;;  %485 = vmatprep.subr.mxu1 %v668_v0  ;;  %v282_v36 = vld [vmem:[#allocation8 + $0x68] sm:$0xff]  ;;  %v281_v37 = vld [vmem:[#allocation8 + $0x60] sm:$0xff]  ;;  %v280_v38 = vld [vmem:[#allocation8 + $0x58] sm:$0xff] }
  0x40   :  { %451 = vmatpush3.msra.mxu0 %v91_v9  ;;  %486 = vmatpush3.msra.mxu1 %v185_v14  ;;  %v279_v39 = vld [vmem:[#allocation8 + $0x50] sm:$0xff]  ;;  %v278_v40 = vld [vmem:[#allocation8 + $0x48] sm:$0xff]  ;;  %v277_v41 = vld [vmem:[#allocation8 + $0x40] sm:$0xff] }
  0x41   :  { %452 = vmatprep.subr.mxu0 %v668_v0  ;;  %487 = vmatprep.subr.mxu1 %v668_v0  ;;  %v276_v42 = vld [vmem:[#allocation8 + $0x38] sm:$0xff]  ;;  %v275_v43 = vld [vmem:[#allocation8 + $0x30] sm:$0xff]  ;;  %v274_v44 = vld [vmem:[#allocation8 + $0x28] sm:$0xff] }
  0x42   :  { %453 = vmatpush3.msra.mxu0 %v90_v11  ;;  %488 = vmatpush3.msra.mxu1 %v184_v16  ;;  %v273_v45 = vld [vmem:[#allocation8 + $0x20] sm:$0xff]  ;;  %v272_v46 = vld [vmem:[#allocation8 + $0x18] sm:$0xff]  ;;  %v271_v52 = vld [vmem:[#allocation8 + $0x10] sm:$0xff] }
  0x43   :  { %454 = vmatprep.subr.mxu0 %v668_v0  ;;  %489 = vmatprep.subr.mxu1 %v668_v0  ;;  %v386_v47 = vld [vmem:[%s800_s2] ss:$0 sm:$0xff]  ;;  %v270_v53 = vld [vmem:[#allocation8 + $0x8] sm:$0xff]  ;;  %v269_v54 = vld [vmem:[#allocation8] sm:$0xff] }
  0x44   :  { %455 = vmatpush3.msra.mxu0 %v89_v13  ;;  %490 = vmatpush3.msra.mxu1 %v183_v18  ;;  %v387_v55 = vld [vmem:[%s802_s4] ss:$0 sm:$0xff]  ;;  %s634_s4 = scalar_lea.vmem %s376_s25, 128 }
  0x45   :  { %456 = vmatprep.subr.mxu0 %v668_v0  ;;  %491 = vmatprep.subr.mxu1 %v668_v0  ;;  %v388_v61 = vld [vmem:[%s804_s6] ss:$0 sm:$0xff]  ;;  %p635_p6 = scmp.ne.s32.totalorder %s376_s25, %s634_s4  ;;  %p640_p8 = scmp.lt.s32.totalorder %s634_s4, %s634_s4 }
  0x46   :  { %457 = vmatpush3.msra.mxu0 %v88_v15  ;;  %492 = vmatpush3.msra.mxu1 %v182_v20 }
  0x47   :  { %458 = vmatprep.subr.mxu0 %v668_v0  ;;  %493 = vmatprep.subr.mxu1 %v668_v0  ;;  %p641_p9 = por %p640_p8, %p639_p7 }
  0x48   :  { %459 = vmatpush3.msra.mxu0 %v87_v17  ;;  %494 = vmatpush3.msra.mxu1 %v181_v22 }
  0x49   :  { %460 = vmatprep.subr.mxu0 %v668_v0  ;;  %495 = vmatprep.subr.mxu1 %v668_v0  ;;  %p642_p10 = pnand %p641_p9, %p635_p6 }
  0x4a   :  { %461 = vmatpush3.msra.mxu0 %v86_v19  ;;  %496 = vmatpush3.msra.mxu1 %v180_v24 }
  0x4b   :  { %462 = vmatprep.subr.mxu0 %v668_v0  ;;  %497 = vmatprep.subr.mxu1 %v668_v0 }
  0x4c   :  { %463 = vmatpush3.msra.mxu0 %v85_v21  ;;  %498 = vmatpush3.msra.mxu1 %v179_v26 }
  0x4d   :  { %464 = vmatprep.subr.mxu0 %v668_v0  ;;  %499 = vmatprep.subr.mxu1 %v668_v0 }
  0x4e   :  { %465 = vmatpush3.msra.mxu0 %v84_v23  ;;  %500 = vmatpush3.msra.mxu1 %v178_v28 }
  0x4f   :  { %466 = vmatprep.subr.mxu0 %v668_v0  ;;  %501 = vmatprep.subr.mxu1 %v668_v0 }
  0x50   :  { %467 = vmatpush3.msra.mxu0 %v83_v25  ;;  %502 = vmatpush3.msra.mxu1 %v177_v31 }
  0x51   :  { %468 = vmatprep.subr.mxu0 %v668_v0  ;;  %503 = vmatprep.subr.mxu1 %v668_v0 }
  0x52   :  { %469 = vmatpush3.msra.mxu0 %v82_v27  ;;  %504 = vmatpush3.msra.mxu1 %v176_v32 }
  0x53   :  { %470 = vmatprep.subr.mxu0 %v668_v0  ;;  %505 = vmatprep.subr.mxu1 %v668_v0 }
  0x54   :  { %471 = vmatpush3.msra.mxu0 %v81_v29  ;;  %506 = vmatpush3.msra.mxu1 %v175_v33 }
  0x55   :  { %473 = vmatmul.mubr.f32.vlgmr.msra.gmra.mxu0 %v80_v30  ;;  %510 = vmatprep.subr.mxu0 %v668_v0 }
  0x56   :  { %542 = vmatprep.mubr.msk.f32.mxu0 %vm669_vm0, %v668_v0  ;;  %511 = vmatpush3.msra.mxu0 %v284_v34 }
  0x57   :  { %512 = vmatprep.subr.mxu0 %v668_v0 }
  0x58   :  { %513 = vmatpush3.msra.mxu0 %v283_v35 }
  0x59   :  { %514 = vmatprep.subr.mxu0 %v668_v0 }
  0x5a   :  { %515 = vmatpush3.msra.mxu0 %v282_v36 }
  0x5b   :  { %516 = vmatprep.subr.mxu0 %v668_v0 }
  0x5c   :  { %517 = vmatpush3.msra.mxu0 %v281_v37 }
  0x5d   :  { %518 = vmatprep.subr.mxu0 %v668_v0 }
  0x5e   :  { %519 = vmatpush3.msra.mxu0 %v280_v38 }
  0x5f   :  { %520 = vmatprep.subr.mxu0 %v668_v0 }
  0x60   :  { %521 = vmatpush3.msra.mxu0 %v279_v39 }
  0x61   :  { %522 = vmatprep.subr.mxu0 %v668_v0 }
  0x62   :  { %523 = vmatpush3.msra.mxu0 %v278_v40 }
  0x63   :  { %524 = vmatprep.subr.mxu0 %v668_v0 }
  0x64   :  { %525 = vmatpush3.msra.mxu0 %v277_v41 }
  0x65   :  { %526 = vmatprep.subr.mxu0 %v668_v0 }
  0x66   :  { %527 = vmatpush3.msra.mxu0 %v276_v42 }
  0x67   :  { %528 = vmatprep.subr.mxu0 %v668_v0 }
  0x68   :  { %529 = vmatpush3.msra.mxu0 %v275_v43 }
  0x69   :  { %530 = vmatprep.subr.mxu0 %v668_v0 }
  0x6a   :  { %531 = vmatpush3.msra.mxu0 %v274_v44 }
  0x6b   :  { %532 = vmatprep.subr.mxu0 %v668_v0 }
  0x6c   :  { %533 = vmatpush3.msra.mxu0 %v273_v45 }
  0x6d   :  { %534 = vmatprep.subr.mxu0 %v668_v0 }
  0x6e   :  { %535 = vmatpush3.msra.mxu0 %v272_v46 }
  0x6f   :  { %536 = vmatprep.subr.mxu0 %v668_v0 }
  0x70   :  { %537 = vmatpush3.msra.mxu0 %v271_v52 }
  0x71   :  { %538 = vmatprep.subr.mxu0 %v668_v0 }
  0x72   :  { %539 = vmatpush3.msra.mxu0 %v270_v53 }
  0x73   :  { %540 = vmatprep.subr.mxu0 %v668_v0 }
  0x74   :  { %541 = vmatpush3.msra.mxu0 %v269_v54 }
 0x115   :  { %v170_v48 = vpop.f32.mrf.mxu0 }
 0x116   :  { %v171_v49 = vadd.f32 %v386_v47, %v170_v48 }
 0x117   :  { %v474_v50 = vpop.f32.mrf.mxu0 }
 0x118   :  { %v174_v51 = vmax.f32 %v171_v49, 0.0 }
 0x11a   :  { %508 = vmatmul.mubr.f32.vlgmr.msra.gmra.mxu1 %v174_v51 }
 0x1da   :  { %v264_v56 = vpop.f32.mrf.mxu1 }
 0x1db   :  { %v265_v57 = vadd.f32 %v387_v55, %v264_v56 }
 0x1dc   :  { %v509_v58 = vpop.f32.mrf.mxu1 }
 0x1dd   :  { %v268_v59 = vmax.f32 %v265_v57, 0.0 }
 0x1df   :  { %543 = vmatmul.mubr.f32.vlgmr.msra.gmra.mxu0 %v268_v59 }
 0x29f   :  { %v358_v62 = vpop.f32.mrf.mxu0 }
 0x2a0   :  { %v359_v1 = vadd.f32 %v388_v61, %v358_v62 }
 0x2a1   :  { %v544_v0 = vpop.f32.mrf.mxu0 }
 0x2a2   :  { %v364_v2 = vmax.f32 %v359_v1, -20.0 }
 0x2a4   :  { %v365_v3 = vmin.f32 %v364_v2, 2.0 }
 0x2a6   :  { %v367_v4 = vsel %vm366_vm1, %v365_v3, %v359_v1 }
 0x2a7   :  { %368 = vst [vmem:[#allocation10] sm:$0xff] %v367_v4 }
 0x2a8   :  { %645 = shalt.err (!%p642_p10)
}
 0x2a9   :  { %378 = dma.vmem_to_hbm [thread:$0]  %s376_s25, 128, %s805_s7, [#allocation4]  }
 0x2aa   :  { %660 = dma.done.wait [#allocation4], 128  }
 0x2ab   :  { %661 = vsyncadd [#allocation4], 4294967168 }
 0x2ac   :  { %382 = vsyncpa [#allocation3], 1 }
 0x2ad   :  { %383 = vsyncpa [#allocation6], 1 }
 0x2ae   :  { %384 = vsyncpa [#allocation9], 1 }
 0x2af   :  { %385 = vsyncpa [#allocation4], 1 }

</bundles_post_ra>
